<compile_context>
chip_gen: v6e
topology: v6e:2x2x1
jax: 0.10.0
libtpu: 0.0.40
codegen_flags: <defaults>
</compile_context>

<pallas_src>
import functools
import math

import jax
import jax.numpy as jnp
from jax import lax
from jax.experimental import pallas as pl
from jax.experimental.pallas import tpu as pltpu

DECODER_IN = 60
HIDDEN = 64
OUT = 3
OUT_PAD = 128   # final-layer columns padded 3 -> 128 (zeros) so the in-kernel
                # transpose is fully (8,128)-aligned; extras dropped pre-store.

_INV_SQRT2 = 1.0 / math.sqrt(2.0)


def _gelu(x, approximate):
    if approximate:
        # tanh-approx GELU: transcendental rides the otherwise-idle EUP slot.
        return jax.nn.gelu(x, approximate=True)
    # PyTorch nn.GELU() default = exact erf-based GELU.
    return 0.5 * x * (1.0 + lax.erf(x * _INV_SQRT2))


def _color_decoder_kernel(x_ref, w1_ref, b1_ref, w2_ref, b2_ref, w3_ref, b3_ref,
                          o_ref, *, approximate_gelu):
    # x block: [tm, 60] f32 -> bf16 for the MXU (f32 accumulation everywhere).
    x = x_ref[...].astype(jnp.bfloat16)

    h1 = jnp.dot(x, w1_ref[...], preferred_element_type=jnp.float32) + b1_ref[...]
    h1 = _gelu(h1, approximate_gelu).astype(jnp.bfloat16)

    h2 = jnp.dot(h1, w2_ref[...], preferred_element_type=jnp.float32) + b2_ref[...]
    h2 = _gelu(h2, approximate_gelu).astype(jnp.bfloat16)

    # Final projection into 128 lane-padded channels (3 real + 125 zero cols).
    h3 = jnp.dot(h2, w3_ref[...], preferred_element_type=jnp.float32) + b3_ref[...]

    # Lane-dense output: aligned XLU transpose [tm, 128] -> [128, tm], keep the
    # 3 real channel rows, store full-lane-width rows to the [3, tm] out block.
    h3_t = jnp.transpose(h3)                      # [OUT_PAD, tm]
    o_ref[...] = jax.nn.sigmoid(h3_t[:OUT, :]).astype(o_ref.dtype)


def _pick_row_tile(n_rows, *, tm_min=128, tm_max=2048, min_steps=4):
    """Largest power-of-two row tile (multiple of 128) <= tm_max that keeps at
    least `min_steps` grid steps for large N; nudges the step count to an even
    number when possible so v7x's two TensorCores split the grid evenly."""
    tm = tm_min
    while tm * 2 <= tm_max and pl.cdiv(n_rows, tm * 2) >= min_steps:
        tm *= 2
    if tm > tm_min:
        steps = pl.cdiv(n_rows, tm)
        if steps > 1 and steps % 2 == 1 and pl.cdiv(n_rows, tm // 2) % 2 == 0:
            tm //= 2
    return tm


def color_decoder(x, params, *, tm=None, approximate_gelu=False):
    """x: [N, 60] float32 -> [N, 3] float32 (sigmoid outputs)."""
    w1, b1, w2, b2, w3, b3 = params
    N, F = x.shape
    assert F == DECODER_IN

    if tm is None:
        tm = _pick_row_tile(N)
    grid = (pl.cdiv(N, tm),)

    # Weights as bf16 (f32 accumulation in-kernel); biases stay f32.
    w1b = w1.astype(jnp.bfloat16)
    w2b = w2.astype(jnp.bfloat16)
    # Tiny one-time pads (16 KiB / 512 B) of the last layer only.
    w3b = jnp.pad(w3.astype(jnp.bfloat16), ((0, 0), (0, OUT_PAD - OUT)))
    b3p = jnp.pad(b3, ((0, 0), (0, OUT_PAD - OUT)))

    # Constant index_map -> weight/bias blocks loaded once, VMEM-resident
    # across all grid steps.
    const_spec = lambda shape: pl.BlockSpec(shape, lambda i: (0, 0))

    kernel = functools.partial(_color_decoder_kernel,
                               approximate_gelu=approximate_gelu)

    out_t = pl.pallas_call(
        kernel,
        out_shape=jax.ShapeDtypeStruct((OUT, N), jnp.float32),
        grid_spec=pltpu.PrefetchScalarGridSpec(
            num_scalar_prefetch=0,
            grid=grid,
            in_specs=[
                # Full K=60 as the last block dim (== array dim) — Pallas
                # lane-pads internally and masks the partial last row-block.
                pl.BlockSpec((tm, DECODER_IN), lambda i: (i, 0)),
                const_spec((DECODER_IN, HIDDEN)),
                const_spec((1, HIDDEN)),
                const_spec((HIDDEN, HIDDEN)),
                const_spec((1, HIDDEN)),
                const_spec((HIDDEN, OUT_PAD)),
                const_spec((1, OUT_PAD)),
            ],
            # Lane-dense [3, N] output: rows = channels, lanes = x rows.
            out_specs=pl.BlockSpec((OUT, tm), lambda i: (0, i)),
        ),
        compiler_params=pltpu.CompilerParams(
            dimension_semantics=("parallel",),
            vmem_limit_bytes=32 * 1024 * 1024,
        ),
    )(x, w1b, b1, w2b, b2, w3b, b3p)

    # Preserve the PyTorch module's [N, 3] output layout. Downstream code that
    # can consume [3, N] directly should take `out_t` and skip this transpose.
    return out_t.T


def init_params(key):
    """Deterministic synthetic init mirroring the nn.Linear shapes ([in, out])."""
    ks = jax.random.split(key, 6)

    def linear_init(kw, kb, fan_in, fan_out):
        bound = 1.0 / math.sqrt(fan_in)
        w = jax.random.uniform(kw, (fan_in, fan_out), jnp.float32, -bound, bound)
        b = jax.random.uniform(kb, (1, fan_out), jnp.float32, -bound, bound)
        return w, b

    w1, b1 = linear_init(ks[0], ks[1], DECODER_IN, HIDDEN)
    w2, b2 = linear_init(ks[2], ks[3], HIDDEN, HIDDEN)
    w3, b3 = linear_init(ks[4], ks[5], HIDDEN, OUT)
    return (w1, b1, w2, b2, w3, b3)


def reference_forward(x, params):
    w1, b1, w2, b2, w3, b3 = params
    h = _gelu(x @ w1 + b1, False)
    h = _gelu(h @ w2 + b2, False)
    return jax.nn.sigmoid(h @ w3 + b3)


if __name__ == "__main__":
    key = jax.random.PRNGKey(0)
    kx, kp = jax.random.split(key)

    # Small demo; a non-multiple row count exercises the masked partial-block
    # path (no wrapper padding anymore).
    N = 300
    x = jax.random.normal(kx, (N, DECODER_IN), jnp.float32)
    params = init_params(kp)

    out = color_decoder(x, params)
    out = jax.block_until_ready(out)

    ref = reference_forward(x, params)
    assert out.shape == (N, OUT)
    # bf16 MXU inputs (f32 accumulation) vs the pure-f32 reference.
    assert jnp.allclose(out, ref, atol=1.5e-2, rtol=1.5e-2)

    print("KERNEL_OK")
</pallas_src>

<mosaic_0001>
module attributes {stable_mosaic.version = 11 : i64} {
  func.func @_color_decoder_kernel(%arg0: i32, %arg1: memref<128x60xf32, #tpu.memory_space<vmem>>, %arg2: memref<60x64xbf16, #tpu.memory_space<vmem>>, %arg3: memref<1x64xf32, #tpu.memory_space<vmem>>, %arg4: memref<64x64xbf16, #tpu.memory_space<vmem>>, %arg5: memref<1x64xf32, #tpu.memory_space<vmem>>, %arg6: memref<64x128xbf16, #tpu.memory_space<vmem>>, %arg7: memref<1x128xf32, #tpu.memory_space<vmem>>, %arg8: memref<3x128xf32, #tpu.memory_space<vmem>>) attributes {dimension_semantics = [#tpu.dimension_semantics<parallel>], iteration_bounds = array<i64: 3>, scalar_prefetch = 0 : i64, scratch_operands = 0 : i64, tpu.core_type = #tpu.core_type<tc>, window_params = [{transform_indices = @transform_0, window_bounds = array<i64: 128, 60>}, {pipeline_mode = #tpu.pipeline_mode<synchronous>, transform_indices = @transform_1, window_bounds = array<i64: 60, 64>}, {pipeline_mode = #tpu.pipeline_mode<synchronous>, transform_indices = @transform_2, window_bounds = array<i64: 1, 64>}, {pipeline_mode = #tpu.pipeline_mode<synchronous>, transform_indices = @transform_3, window_bounds = array<i64: 64, 64>}, {pipeline_mode = #tpu.pipeline_mode<synchronous>, transform_indices = @transform_4, window_bounds = array<i64: 1, 64>}, {pipeline_mode = #tpu.pipeline_mode<synchronous>, transform_indices = @transform_5, window_bounds = array<i64: 64, 128>}, {pipeline_mode = #tpu.pipeline_mode<synchronous>, transform_indices = @transform_6, window_bounds = array<i64: 1, 128>}, {transform_indices = @transform_7, window_bounds = array<i64: 3, 128>}]} {
    %c0 = arith.constant 0 : index
    %c0_0 = arith.constant 0 : index
    %0 = vector.load %arg1[%c0, %c0_0] : memref<128x60xf32, #tpu.memory_space<vmem>>, vector<128x60xf32>
    %1 = arith.truncf %0 : vector<128x60xf32> to vector<128x60xbf16>
    %c0_1 = arith.constant 0 : index
    %c0_2 = arith.constant 0 : index
    %2 = vector.load %arg2[%c0_1, %c0_2] : memref<60x64xbf16, #tpu.memory_space<vmem>>, vector<60x64xbf16>
    %cst = arith.constant dense<0.000000e+00> : vector<128x64xf32>
    %3 = tpu.matmul %1, %2, %cst {dimension_numbers = #tpu.dot_dimension_numbers<[1], [0], [0], [1], [0, 0, 1, 1], [], []>} : vector<128x60xbf16>, vector<60x64xbf16>, vector<128x64xf32> -> vector<128x64xf32>
    %c0_3 = arith.constant 0 : index
    %c0_4 = arith.constant 0 : index
    %4 = vector.load %arg3[%c0_3, %c0_4] : memref<1x64xf32, #tpu.memory_space<vmem>>, vector<1x64xf32>
    %5 = vector.broadcast %4 : vector<1x64xf32> to vector<128x64xf32>
    %6 = arith.addf %3, %5 : vector<128x64xf32>
    %cst_5 = arith.constant 5.000000e-01 : f32
    %7 = vector.broadcast %cst_5 : f32 to vector<128x64xf32>
    %8 = arith.mulf %7, %6 : vector<128x64xf32>
    %cst_6 = arith.constant 0.707106769 : f32
    %9 = vector.broadcast %cst_6 : f32 to vector<128x64xf32>
    %10 = arith.mulf %6, %9 : vector<128x64xf32>
    %11 = math.erf %10 : vector<128x64xf32>
    %cst_7 = arith.constant 1.000000e+00 : f32
    %12 = vector.broadcast %cst_7 : f32 to vector<128x64xf32>
    %13 = arith.addf %12, %11 : vector<128x64xf32>
    %14 = arith.mulf %8, %13 : vector<128x64xf32>
    %15 = arith.truncf %14 : vector<128x64xf32> to vector<128x64xbf16>
    %c0_8 = arith.constant 0 : index
    %c0_9 = arith.constant 0 : index
    %16 = vector.load %arg4[%c0_8, %c0_9] : memref<64x64xbf16, #tpu.memory_space<vmem>>, vector<64x64xbf16>
    %cst_10 = arith.constant dense<0.000000e+00> : vector<128x64xf32>
    %17 = tpu.matmul %15, %16, %cst_10 {dimension_numbers = #tpu.dot_dimension_numbers<[1], [0], [0], [1], [0, 0, 1, 1], [], []>} : vector<128x64xbf16>, vector<64x64xbf16>, vector<128x64xf32> -> vector<128x64xf32>
    %c0_11 = arith.constant 0 : index
    %c0_12 = arith.constant 0 : index
    %18 = vector.load %arg5[%c0_11, %c0_12] : memref<1x64xf32, #tpu.memory_space<vmem>>, vector<1x64xf32>
    %19 = vector.broadcast %18 : vector<1x64xf32> to vector<128x64xf32>
    %20 = arith.addf %17, %19 : vector<128x64xf32>
    %cst_13 = arith.constant 5.000000e-01 : f32
    %21 = vector.broadcast %cst_13 : f32 to vector<128x64xf32>
    %22 = arith.mulf %21, %20 : vector<128x64xf32>
    %cst_14 = arith.constant 0.707106769 : f32
    %23 = vector.broadcast %cst_14 : f32 to vector<128x64xf32>
    %24 = arith.mulf %20, %23 : vector<128x64xf32>
    %25 = math.erf %24 : vector<128x64xf32>
    %cst_15 = arith.constant 1.000000e+00 : f32
    %26 = vector.broadcast %cst_15 : f32 to vector<128x64xf32>
    %27 = arith.addf %26, %25 : vector<128x64xf32>
    %28 = arith.mulf %22, %27 : vector<128x64xf32>
    %29 = arith.truncf %28 : vector<128x64xf32> to vector<128x64xbf16>
    %c0_16 = arith.constant 0 : index
    %c0_17 = arith.constant 0 : index
    %30 = vector.load %arg6[%c0_16, %c0_17] : memref<64x128xbf16, #tpu.memory_space<vmem>>, vector<64x128xbf16>
    %cst_18 = arith.constant dense<0.000000e+00> : vector<128x128xf32>
    %31 = tpu.matmul %29, %30, %cst_18 {dimension_numbers = #tpu.dot_dimension_numbers<[1], [0], [0], [1], [0, 0, 1, 1], [], []>} : vector<128x64xbf16>, vector<64x128xbf16>, vector<128x128xf32> -> vector<128x128xf32>
    %c0_19 = arith.constant 0 : index
    %c0_20 = arith.constant 0 : index
    %32 = vector.load %arg7[%c0_19, %c0_20] : memref<1x128xf32, #tpu.memory_space<vmem>>, vector<1x128xf32>
    %33 = vector.broadcast %32 : vector<1x128xf32> to vector<128x128xf32>
    %34 = arith.addf %31, %33 : vector<128x128xf32>
    %35 = tpu.transpose %34, [1, 0] : vector<128x128xf32> -> vector<128x128xf32>
    %36 = vector.extract_strided_slice %35 {offsets = [0, 0], sizes = [3, 128], strides = [1, 1]} : vector<128x128xf32> to vector<3x128xf32>
    %37 = arith.negf %36 : vector<3x128xf32>
    %38 = math.exp %37 : vector<3x128xf32>
    %cst_21 = arith.constant 1.000000e+00 : f32
    %39 = vector.broadcast %cst_21 : f32 to vector<3x128xf32>
    %40 = arith.addf %39, %38 : vector<3x128xf32>
    %41 = arith.divf %39, %40 : vector<3x128xf32>
    %c0_22 = arith.constant 0 : index
    %c0_23 = arith.constant 0 : index
    %42 = vector.load %arg8[%c0_22, %c0_23] : memref<3x128xf32, #tpu.memory_space<vmem>>, vector<3x128xf32>
    tpu.vector_store %arg8[%c0_22, %c0_23], %41 {strides = array<i32>} : memref<3x128xf32, #tpu.memory_space<vmem>>, vector<3x128xf32>,
    return
  }
  func.func @transform_0(%arg0: i32) -> (i32, i32) {
    %c0_i32 = arith.constant 0 : i32
    %c0_i32_0 = arith.constant 0 : i32
    return %arg0, %c0_i32 : i32, i32
  }
  func.func @transform_1(%arg0: i32) -> (i32, i32) {
    %c0_i32 = arith.constant 0 : i32
    %c0_i32_0 = arith.constant 0 : i32
    %c0_i32_1 = arith.constant 0 : i32
    return %c0_i32, %c0_i32_0 : i32, i32
  }
  func.func @transform_2(%arg0: i32) -> (i32, i32) {
    %c0_i32 = arith.constant 0 : i32
    %c0_i32_0 = arith.constant 0 : i32
    %c0_i32_1 = arith.constant 0 : i32
    return %c0_i32, %c0_i32_0 : i32, i32
  }
  func.func @transform_3(%arg0: i32) -> (i32, i32) {
    %c0_i32 = arith.constant 0 : i32
    %c0_i32_0 = arith.constant 0 : i32
    %c0_i32_1 = arith.constant 0 : i32
    return %c0_i32, %c0_i32_0 : i32, i32
  }
  func.func @transform_4(%arg0: i32) -> (i32, i32) {
    %c0_i32 = arith.constant 0 : i32
    %c0_i32_0 = arith.constant 0 : i32
    %c0_i32_1 = arith.constant 0 : i32
    return %c0_i32, %c0_i32_0 : i32, i32
  }
  func.func @transform_5(%arg0: i32) -> (i32, i32) {
    %c0_i32 = arith.constant 0 : i32
    %c0_i32_0 = arith.constant 0 : i32
    %c0_i32_1 = arith.constant 0 : i32
    return %c0_i32, %c0_i32_0 : i32, i32
  }
  func.func @transform_6(%arg0: i32) -> (i32, i32) {
    %c0_i32 = arith.constant 0 : i32
    %c0_i32_0 = arith.constant 0 : i32
    %c0_i32_1 = arith.constant 0 : i32
    return %c0_i32, %c0_i32_0 : i32, i32
  }
  func.func @transform_7(%arg0: i32) -> (i32, i32) {
    %c0_i32 = arith.constant 0 : i32
    %c0_i32_0 = arith.constant 0 : i32
    return %c0_i32, %arg0 : i32, i32
  }
}

</mosaic_0001>

<bundles_post_ra>
// kernel: tpu_custom_call.1
= control target key start
LH: loop header
LB: loop body
LE: loop exit
PB: predicated region body
PF: predicated region fallthrough
CT: control target
= control target key end

     0   :  { %12 = vsyncpa [#allocation3], 0  ;;  %s1761_s0 = inlined_call_operand.vmem [shape: f32[300,60], index: 0, kind: input, shape index: {}]   ;;  %s1762_s1 = inlined_call_operand.vmem [shape: bf16[60,64], index: 1, kind: input, shape index: {}]   ;;  %s1763_s2 = inlined_call_operand.vmem [shape: f32[1,64], index: 2, kind: input, shape index: {}]   ;;  %s1764_s3 = inlined_call_operand.vmem [shape: bf16[64,64], index: 3, kind: input, shape index: {}]   ;;  %s1765_s4 = inlined_call_operand.vmem [shape: f32[1,64], index: 4, kind: input, shape index: {}]   ;;  %s1766_s5 = inlined_call_operand.vmem [shape: bf16[64,128], index: 5, kind: input, shape index: {}]   ;;  %s1767_s6 = inlined_call_operand.vmem [shape: f32[1,128], index: 6, kind: input, shape index: {}]   ;;  %s1768_s7 = inlined_call_operand.hbm [shape: f32[3,300], index: 7, kind: output, shape index: {}]  }
   0x1   :  { %14 = vsyncpa [#allocation3 + $0x1], 0  ;;  %s1488_s24 = smov 0   ;;  %s1490_s25 = smov 0  }
   0x2   :  { %s1492_s26 = smov 0   ;;  %s1494_s27 = smov 0  }
   0x3 LB: > { %s1509_s28 = sadd.s32 4294967295, %s1445_s27   ;;  %s1097_s29 = sadd.s32 4294967294, %s1445_s27   ;;  %s1445_s27 = sphi %s1494_s27, %s1774_s27   ;;  %s1441_s26 = sphi %s1492_s26, %s1773_s26   ;;  %s1437_s25 = sphi %s1490_s25, %s1772_s25   ;;  %s1433_s24 = sphi %s1488_s24, %s1771_s24  }
   0x4   : > { %s1513_s30 = sadd.s32 1, %s1445_s27   ;;  %s179_s8 = sadd.s32 1, %s1441_s26 }
   0x5   : > { %s176_s9 = ssub.s32 %s1445_s27, %s1513_s30  ;;  %p189_p0 = scmp.ne.s32.totalorder %s1441_s26, %s1437_s25 }
   0x6   : > { %p177_p1 = scmp.eq.s32.totalorder %s176_s9, 0  ;;  %p190_p2 = scmp.eq.s32.totalorder %s1509_s28, 2 }
   0x7   : > { %p195_p3 = scmp.ne.s32.totalorder %s1437_s25, %s1433_s24  ;;  %p196_p4 = scmp.eq.s32.totalorder %s1097_s29, 2 }
   0x8   : > { %s1524_s10 = scalar_select %p177_p1, %s1441_s26, %s179_s8  }
   0x9   : > { %p1526_p5 = por %p190_p2, %p189_p0  ;;  %p1530_p6 = por %p196_p4, %p195_p3 }
   0xa   : > { %p1100_p7 = scmp.ge.s32.totalorder %s1445_s27, 1  ;;  %p249_p8 = scmp.lt.s32.totalorder %s1445_s27, 4 }
   0xc   : > { %p250_p9 = pnand %p1100_p7, %p249_p8 }
   0xd   : > { %s1102_s17 = sshll.u32 (!%p250_p9), %s1509_s28, 4  ;;  %s282_s20 = sand.u32 (!%p250_p9), 1, %s1437_s25  }
   0xe   : > { %253 = sbr.rel (%p250_p9) target bundleno = 851 (0x353), region = 48  ;;  %p290_p10 = scmp.lt.s32.totalorder (!%p250_p9), %s1102_s17, 37 }
   0xf   : > { %s1101_s21 = sshll.u32 (!%p250_p9), %s282_s20, 2  ;;  %s1025_s14 = scalar_lea.sflag (!%p250_p9), [#allocation3], %s282_s20 }
  0x10   : > { %s284_s23 = scalar_lea.vmem (!%p250_p9), [#allocation2], %s1101_s21  ;;  %s1447_s16 = smov (!%p250_p9), [#allocation2]  }
  0x11   : > { %s1038_s29 = sshll.u32 (!%p250_p9), %s284_s23, 4  ;;  %s1039_s29 = int_to_ptr.vmem [resolvable:$true] %s1038_s29 }
  0x12   : > { %s1385_s15 = scalar_lea.vmem (!%p250_p9), %s1039_s29, 64 }
  0x13   : > { %v1305_v0 = vld [vmem:[%s1762_s1 + $0x18] sm:$0x3f]   ;;  %vm387_vm0 = vcmask 1045504   ;;  %v1306_v1 = vld [vmem:[%s1762_s1 + $0x10] sm:$0xff]   ;;  %v1307_v3 = vld [vmem:[%s1762_s1 + $0x8] sm:$0xff]   ;;  %s1776_s17 = smov (!%p290_p10, %s1102_s17), 37  ;;  %p1386_p11 = scmp.ne.s32.totalorder %s1039_s29, %s1385_s15 }
  0x14   : > { %1264 = vmatprep.subr.msk.bf16.mxu0 %vm387_vm0, %v1305_v0  ;;  %v389_v2 = vsel %vm387_vm0, %v1305_v0, 0  ;;  %1265 = vmatprep.subr.msk.bf16.mxu1 %vm387_vm0, %v1305_v0  ;;  %v1308_v4 = vld [vmem:[%s1762_s1] sm:$0xff]   ;;  %s1103_s22 = sshll.u32 %s1776_s17, 3  ;;  %vm362_vm1 = vcmask 490496   ;;  %v1309_v29 = vld [vmem:[%s1764_s3 + $0x18] sm:$0xff]   ;;  %v1310_v30 = vld [vmem:[%s1764_s3 + $0x10] sm:$0xff]  }
  0x15   : > { %1185 = vmatpush3.bf16.msra.mxu0 %v389_v2  ;;  %1260 = vmatpush3.bf16.msra.mxu1 %v389_v2  ;;  %s1552_s8 = scalar_lea.vmem %s1761_s0, %s1103_s22  ;;  %v1311_v31 = vld [vmem:[%s1764_s3 + $0x8] sm:$0xff]   ;;  %v1312_v32 = vld [vmem:[%s1764_s3] sm:$0xff]   ;;  %vm615_vm2 = vcmask 523264   ;;  %s1145_s22 = sshll.u32 %s1509_s28, 6 }
  0x16   : > { %1186 = vmatprep.subr.bf16.mxu0 %v1306_v1  ;;  %1257 = vmatprep.subr.bf16.mxu1 %v1306_v1  ;;  %v300_v5 = vld [vmem:[%s1552_s8] sm:$0xff]  ;;  %v301_v6 = vld [vmem:[%s1552_s8 + $0x8] sm:$0xff]  ;;  %v302_v8 = vld [vmem:[%s1552_s8 + $0x10] sm:$0xff]  ;;  %s1726_s13 = scalar_lea.hbm %s1768_s7, %s1145_s22  ;;  %p1387_p12 = pnand %p1386_p11, %p1526_p5 }
  0x17   : > { %v316_v7 = vpack.c.bf16 %v301_v6, %v300_v5  ;;  %v303_v9 = vld [vmem:[%s1552_s8 + $0x18] sm:$0xff]  ;;  %v304_v10 = vld [vmem:[%s1552_s8 + $0x20] sm:$0xff]  ;;  %v305_v11 = vld [vmem:[%s1552_s8 + $0x28] sm:$0xff]  ;;  %s1389_s17 = sshll.u32 %s1447_s16, 4  ;;  %s1390_s17 = int_to_ptr.vmem [resolvable:$false] %s1389_s17 }
  0x18   : > { %v308_v12 = vld [vmem:[%s1552_s8 + $0x40] sm:$0xff]  ;;  %v309_v13 = vld [vmem:[%s1552_s8 + $0x48] sm:$0xff]  ;;  %v310_v14 = vld [vmem:[%s1552_s8 + $0x50] sm:$0xff]  ;;  %v317_v16 = vpack.c.bf16 %v303_v9, %v302_v8  ;;  %v318_v21 = vpack.c.bf16 %v305_v11, %v304_v10  ;;  %p1388_p13 = pneg %p1387_p12  ;;  %s1391_s28 = scalar_lea.vmem %s1390_s17, 128 }
  0x19   : > { %1187 = vmatpush3.bf16.msra.mxu0 %v1306_v1  ;;  %1261 = vmatpush3.bf16.msra.mxu1 %v1306_v1  ;;  %v311_v15 = vld [vmem:[%s1552_s8 + $0x58] sm:$0xff]  ;;  %v320_v17 = vpack.c.bf16 %v309_v13, %v308_v12  ;;  %v312_v19 = vld [vmem:[%s1552_s8 + $0x60] sm:$0xff]  ;;  %v313_v20 = vld [vmem:[%s1552_s8 + $0x68] sm:$0xff]  ;;  %p1392_p0 = scmp.lt.s32.totalorder %s1039_s29, %s1390_s17  ;;  %p1393_p1 = scmp.lt.s32.totalorder %s1391_s28, %s1385_s15 }
  0x1a   : > { %1188 = vmatprep.subr.bf16.mxu0 %v1307_v3  ;;  %1258 = vmatprep.subr.bf16.mxu1 %v1307_v3  ;;  %v321_v18 = vpack.c.bf16 %v311_v15, %v310_v14  ;;  %v322_v22 = vpack.c.bf16 %v313_v20, %v312_v19  ;;  %v306_v23 = vld [vmem:[%s1552_s8 + $0x30] sm:$0xff]  ;;  %v307_v24 = vld [vmem:[%s1552_s8 + $0x38] sm:$0xff]  ;;  %v1104_v33 = vld [vmem:[%s1763_s2] ss:$0 sm:$0xff] }
  0x1b   : > { %1192 = vmatprep.mubr.msk.bf16.mxu0 %vm362_vm1, %v316_v7  ;;  %1200 = vmatprep.mubr.msk.bf16.mxu1 %vm362_vm1, %v320_v17  ;;  %v314_v25 = vld [vmem:[%s1552_s8 + $0x70] sm:$0xff]  ;;  %v315_v26 = vld [vmem:[%s1552_s8 + $0x78] sm:$0xff]  ;;  %v319_v27 = vpack.c.bf16 %v307_v24, %v306_v23  ;;  %p1394_p2 = por %p1393_p1, %p1392_p0 }
  0x1c   : > { %v323_v28 = vpack.c.bf16 %v315_v26, %v314_v25 }
  0x1d   : > { %1189 = vmatpush3.bf16.msra.mxu0 %v1307_v3  ;;  %1262 = vmatpush3.bf16.msra.mxu1 %v1307_v3  ;;  %p1395_p3 = pnand %p1394_p2, %p1388_p13 }
  0x1e   : > { %1190 = vmatprep.subr.bf16.mxu0 %v1308_v4  ;;  %1259 = vmatprep.subr.bf16.mxu1 %v1308_v4 }
  0x21   : > { %1191 = vmatpush3.bf16.msra.mxu0 %v1308_v4  ;;  %1263 = vmatpush3.bf16.msra.mxu1 %v1308_v4 }
  0x22   : > { %1208 = vmatprep.subr.bf16.mxu1 %v1309_v29 }
  0x24   : > { %1193 = vmatmul.mubr.msk.bf16.vlgmr.msra.gmra.mxu0 %vm362_vm1, %v317_v16  ;;  %1201 = vmatmul.mubr.msk.bf16.vlgmr.msra.gmra.mxu1 %vm362_vm1, %v321_v18 }
  0x25   : > { %1196 = vmatprep.mubr.msk.bf16.mxu0 %vm362_vm1, %v318_v21  ;;  %1204 = vmatprep.mubr.msk.bf16.mxu1 %vm362_vm1, %v322_v22 }
  0x26   : > { %1209 = vmatpush3.bf16.msra.mxu1 %v1309_v29 }
  0x27   : > { %1210 = vmatprep.subr.bf16.mxu1 %v1310_v30 }
  0x2a   : > { %1211 = vmatpush3.bf16.msra.mxu1 %v1310_v30 }
  0x2b   : > { %1212 = vmatprep.subr.bf16.mxu1 %v1311_v31 }
  0x2c   : > { %1197 = vmatmul.mubr.msk.bf16.gmra.mxu0 %vm362_vm1, %v319_v27  ;;  %1205 = vmatmul.mubr.msk.bf16.gmra.mxu1 %vm362_vm1, %v323_v28 }
  0x2e   : > { %1213 = vmatpush3.bf16.msra.mxu1 %v1311_v31 }
  0x2f   : > { %1214 = vmatprep.subr.bf16.mxu1 %v1312_v32 }
  0x32   : > { %1215 = vmatpush3.bf16.msra.mxu1 %v1312_v32 }
  0xe4   : > { %v1194_v34 = vpop.f32.mrf.mxu0  ;;  %v1202_v35 = vpop.f32.mrf.mxu1 }
  0xe5   : > { %v1593_v36 = vadd.f32 %v1194_v34, %v1104_v33  ;;  %v1606_v57 = vadd.f32 %v1202_v35, %v1104_v33 }
  0xe6   : > { %v425_v37 = vpop.f32.mrf.mxu0  ;;  %v457_v38 = vpop.f32.mrf.mxu1 }
  0xe7   : > { %v1595_v39 = vadd.f32 %v1104_v33, %v425_v37  ;;  %v506_v40 = vmul.f32 0.70710677, %v1593_v36  ;;  %v1598_v42 = vadd.f32 %v1104_v33, %v457_v38  ;;  %v514_v3 = vmul.f32 0.70710677, %v1606_v57 }
  0xe8   : > { %v1195_v41 = vpop.f32.mrf.mxu0  ;;  %v1203_v43 = vpop.f32.mrf.mxu1  ;;  %v490_v31 = vmul.f32 0.5, %v1593_v36 }
  0xe9   : > { %v504_v44 = vmul.f32 0.70710677, %v1595_v39  ;;  %v437_v45 = vadd.f32 %v1195_v41, %v1104_v33  ;;  %v512_v51 = vmul.f32 0.70710677, %v1598_v42  ;;  %v1616_v5 = vadd.f32 %v1203_v43, %v1104_v33 }
  0xea   : > { %v428_v46 = vpop.f32.mrf.mxu0  ;;  %v460_v47 = vpop.f32.mrf.mxu1  ;;  %v488_v27 = vmul.f32 0.5, %v1595_v39  ;;  %v496_v38 = vmul.f32 0.5, %v1598_v42 }
  0xeb   : > { %1317 = verf.f32 %v504_v44  ;;  %v507_v48 = vmul.f32 0.70710677, %v437_v45  ;;  %v429_v49 = vadd.f32 %v1104_v33, %v428_v46  ;;  %v1602_v52 = vadd.f32 %v1104_v33, %v460_v47 }
  0xec   : > { %1319 = verf.f32 %v506_v40  ;;  %v1198_v50 = vpop.f32.mrf.mxu0  ;;  %v1206_v53 = vpop.f32.mrf.mxu1  ;;  %v515_v12 = vmul.f32 0.70710677, %v1616_v5  ;;  %v491_v24 = vmul.f32 0.5, %v437_v45 }
  0xed   : > { %1321 = verf.f32 %v507_v48  ;;  %v505_v54 = vmul.f32 0.70710677, %v429_v49  ;;  %v1604_v55 = vadd.f32 %v1198_v50, %v1104_v33  ;;  %v513_v58 = vmul.f32 0.70710677, %v1602_v52 }
  0xee   : > { %v441_v56 = vpop.f32.mrf.mxu0  ;;  %v473_v59 = vpop.f32.mrf.mxu1  ;;  %v1623_v14 = vadd.f32 %v1206_v53, %v1104_v33  ;;  %v489_v28 = vmul.f32 0.5, %v429_v49  ;;  %v497_v39 = vmul.f32 0.5, %v1602_v52 }
  0xef   : > { %1323 = verf.f32 %v505_v54  ;;  %v1609_v60 = vadd.f32 %v1104_v33, %v441_v56  ;;  %v510_v61 = vmul.f32 0.70710677, %v1604_v55  ;;  %v1612_v63 = vadd.f32 %v1104_v33, %v473_v59 }
  0xf0   : > { %v1199_v62 = vpop.f32.mrf.mxu0  ;;  %1325 = verf.f32 %v512_v51  ;;  %v1207_v0 = vpop.f32.mrf.mxu1  ;;  %v518_v21 = vmul.f32 0.70710677, %v1623_v14 }
  0xf1   : > { %v508_v1 = vmul.f32 0.70710677, %v1609_v60  ;;  %v453_v2 = vadd.f32 %v1199_v62, %v1104_v33  ;;  %1327 = verf.f32 %v513_v58  ;;  %v516_v9 = vmul.f32 0.70710677, %v1612_v63 }
  0xf2   : > { %v444_v4 = vpop.f32.mrf.mxu0  ;;  %v476_v6 = vpop.f32.mrf.mxu1  ;;  %v1625_v16 = vadd.f32 %v1207_v0, %v1104_v33  ;;  %v492_v51 = vmul.f32 0.5, %v1609_v60  ;;  %v500_v60 = vmul.f32 0.5, %v1612_v63 }
  0xf3   : > { %1329 = verf.f32 %v508_v1  ;;  %v511_v7 = vmul.f32 0.70710677, %v453_v2  ;;  %v445_v8 = vadd.f32 %v1104_v33, %v444_v4  ;;  %v1619_v10 = vadd.f32 %v1104_v33, %v476_v6 }
  0xf4   : > { %1331 = verf.f32 %v510_v61  ;;  %v519_v25 = vmul.f32 0.70710677, %v1625_v16  ;;  %v495_v42 = vmul.f32 0.5, %v453_v2  ;;  %v494_v61 = vmul.f32 0.5, %v1604_v55 }
  0xf5   : > { %1333 = verf.f32 %v511_v7  ;;  %v509_v11 = vmul.f32 0.70710677, %v445_v8  ;;  %v517_v13 = vmul.f32 0.70710677, %v1619_v10  ;;  %v493_v56 = vmul.f32 0.5, %v445_v8 }
  0xf6   : > { %1335 = verf.f32 %v514_v3  ;;  %v498_v6 = vmul.f32 0.5, %v1606_v57  ;;  %v501_v2 = vmul.f32 0.5, %v1619_v10 }
  0xf7   : > { %1337 = verf.f32 %v509_v11 }
  0xf8   : > { %v1318_v15 = vpop.eup %1317  ;;  %1339 = verf.f32 %v516_v9 }
  0xf9   : > { %v1320_v17 = vpop.eup %1319  ;;  %1341 = verf.f32 %v517_v13  ;;  %v536_v19 = vadd.f32 1.0, %v1318_v15  ;;  %v499_v15 = vmul.f32 0.5, %v1616_v5 }
  0xfa   : > { %v1322_v18 = vpop.eup %1321  ;;  %1343 = verf.f32 %v515_v12  ;;  %v538_v23 = vadd.f32 1.0, %v1320_v17 }
  0xfb   : > { %v539_v20 = vadd.f32 1.0, %v1322_v18  ;;  %v552_v33 = vmul.f32 %v536_v19, %v488_v27  ;;  %1345 = verf.f32 %v518_v21 }
  0xfc   : > { %v1324_v22 = vpop.eup %1323  ;;  %v554_v37 = vmul.f32 %v538_v23, %v490_v31  ;;  %1347 = verf.f32 %v519_v25 }
  0xfd   : > { %v1326_v26 = vpop.eup %1325  ;;  %v537_v29 = vadd.f32 1.0, %v1324_v22  ;;  %v555_v32 = vmul.f32 %v539_v20, %v491_v24  ;;  %v502_v20 = vmul.f32 0.5, %v1623_v14  ;;  %v503_v22 = vmul.f32 0.5, %v1625_v16  ;;  %v1314_v14 = vld [vmem:[%s1766_s5 + $0x10] sm:$0xff]   ;;  %v1315_v16 = vld [vmem:[%s1766_s5 + $0x8] sm:$0xff]  }
  0xfe   : > { %v1328_v30 = vpop.eup %1327  ;;  %v544_v43 = vadd.f32 1.0, %v1326_v26 }
  0xff   : > { %v553_v34 = vmul.f32 %v537_v29, %v489_v28  ;;  %v545_v44 = vadd.f32 1.0, %v1328_v30  ;;  %v569_v46 = vpack.c.bf16 %v555_v32, %v554_v37  ;;  %v1313_v28 = vld [vmem:[%s1766_s5 + $0x18] sm:$0xff]   ;;  %v1316_v29 = vld [vmem:[%s1766_s5] sm:$0xff]  }
 0x100   : > { %v1330_v35 = vpop.eup %1329  ;;  %v560_v54 = vmul.f32 %v544_v43, %v496_v38  ;;  %1232 = vmatprep.subr.bf16.mxu0 %v1313_v28  ;;  %v1664_v30 = vld [vmem:[%s1765_s4] ss:$0 sm:$0xff] }
 0x101   : > { %v1332_v40 = vpop.eup %1331  ;;  %v568_v41 = vpack.c.bf16 %v553_v34, %v552_v33  ;;  %v540_v36 = vadd.f32 1.0, %v1330_v35  ;;  %v561_v52 = vmul.f32 %v545_v44, %v497_v39  ;;  %1233 = vmatpush3.bf16.msra.mxu0 %v1313_v28 }
 0x102   : > { %v1334_v45 = vpop.eup %1333  ;;  %v542_v50 = vadd.f32 1.0, %v1332_v40  ;;  %1234 = vmatprep.subr.bf16.mxu0 %v1314_v14 }
 0x103   : > { %v1336_v47 = vpop.eup %1335  ;;  %v543_v48 = vadd.f32 1.0, %v1334_v45  ;;  %1216 = vmatprep.mubr.msk.bf16.mxu1 %vm615_vm2, %v568_v41  ;;  %v556_v1 = vmul.f32 %v540_v36, %v492_v51  ;;  %v572_v9 = vpack.c.bf16 %v561_v52, %v560_v54 }
 0x104   : > { %v1338_v49 = vpop.eup %1337  ;;  %1217 = vmatmul.mubr.msk.bf16.vlgmr.msra.gmra.mxu1 %vm615_vm2, %v569_v46  ;;  %v558_v4 = vmul.f32 %v542_v50, %v494_v61  ;;  %v546_v12 = vadd.f32 1.0, %v1336_v47 }
 0x105   : > { %v1340_v53 = vpop.eup %1339  ;;  %v541_v58 = vadd.f32 1.0, %v1338_v49  ;;  %v559_v62 = vmul.f32 %v543_v48, %v495_v42  ;;  %1235 = vmatpush3.bf16.msra.mxu0 %v1314_v14 }
 0x106   : > { %v1342_v59 = vpop.eup %1341  ;;  %v548_v11 = vadd.f32 1.0, %v1340_v53  ;;  %v562_v63 = vmul.f32 %v546_v12, %v498_v6  ;;  %1236 = vmatprep.subr.bf16.mxu0 %v1315_v16 }
 0x107   : > { %v1344_v0 = vpop.eup %1343  ;;  %v557_v3 = vmul.f32 %v541_v58, %v493_v56  ;;  %v549_v8 = vadd.f32 1.0, %v1342_v59  ;;  %v571_v13 = vpack.c.bf16 %v559_v62, %v558_v4 }
 0x108   : > { %v547_v55 = vadd.f32 1.0, %v1344_v0  ;;  %v1346_v17 = vpop.eup %1345  ;;  %v564_v57 = vmul.f32 %v548_v11, %v500_v60 }
 0x109   : > { %v570_v7 = vpack.c.bf16 %v557_v3, %v556_v1  ;;  %v1348_v18 = vpop.eup %1347  ;;  %v565_v19 = vmul.f32 %v549_v8, %v501_v2  ;;  %v550_v21 = vadd.f32 1.0, %v1346_v17  ;;  %1237 = vmatpush3.bf16.msra.mxu0 %v1315_v16 }
 0x10a   : > { %v563_v10 = vmul.f32 %v547_v55, %v499_v15  ;;  %v551_v23 = vadd.f32 1.0, %v1348_v18  ;;  %1238 = vmatprep.subr.bf16.mxu0 %v1316_v29 }
 0x10b   : > { %1220 = vmatprep.mubr.msk.bf16.mxu1 %vm615_vm2, %v570_v7  ;;  %v574_v5 = vpack.c.bf16 %v565_v19, %v564_v57  ;;  %v566_v25 = vmul.f32 %v550_v21, %v502_v20 }
 0x10c   : > { %1221 = vmatmul.mubr.msk.bf16.gmra.mxu1 %vm615_vm2, %v571_v13  ;;  %v573_v24 = vpack.c.bf16 %v563_v10, %v562_v63  ;;  %v567_v26 = vmul.f32 %v551_v23, %v503_v22 }
 0x10d   : > { %1224 = vmatprep.mubr.msk.bf16.mxu1 %vm615_vm2, %v572_v9  ;;  %1239 = vmatpush3.bf16.msra.mxu0 %v1316_v29 }
 0x10e   : > { %v575_v27 = vpack.c.bf16 %v567_v26, %v566_v25 }
 0x114   : > { %1225 = vmatmul.mubr.msk.bf16.gmra.mxu1 %vm615_vm2, %v573_v24 }
 0x115   : > { %1228 = vmatprep.mubr.msk.bf16.mxu1 %vm615_vm2, %v574_v5 }
 0x11c   : > { %1229 = vmatmul.mubr.msk.bf16.gmra.mxu1 %vm615_vm2, %v575_v27 }
 0x1c4   : > { %v1218_v31 = vpop.f32.mrf.mxu1 }
 0x1c5   : > { %v683_v32 = vadd.f32 %v1218_v31, %v1664_v30 }
 0x1c6   : > { %v674_v33 = vpop.f32.mrf.mxu1 }
 0x1c7   : > { %v675_v34 = vadd.f32 %v1664_v30, %v674_v33  ;;  %v755_v35 = vmul.f32 0.70710677, %v683_v32  ;;  %v739_v63 = vmul.f32 0.5, %v683_v32 }
 0x1c8   : > { %v1219_v37 = vpop.f32.mrf.mxu1 }
 0x1c9   : > { %v753_v38 = vmul.f32 0.70710677, %v675_v34  ;;  %v686_v40 = vadd.f32 %v1219_v37, %v1664_v30  ;;  %v737_v60 = vmul.f32 0.5, %v675_v34 }
 0x1ca   : > { %v677_v41 = vpop.f32.mrf.mxu1 }
 0x1cb   : > { %1349 = verf.f32 %v753_v38  ;;  %v756_v43 = vmul.f32 0.70710677, %v686_v40  ;;  %v678_v39 = vadd.f32 %v1664_v30, %v677_v41  ;;  %v740_v15 = vmul.f32 0.5, %v686_v40 }
 0x1cc   : > { %1351 = verf.f32 %v755_v35  ;;  %v1222_v44 = vpop.f32.mrf.mxu1 }
 0x1cd   : > { %1353 = verf.f32 %v756_v43  ;;  %v754_v45 = vmul.f32 0.70710677, %v678_v39  ;;  %v1671_v46 = vadd.f32 %v1222_v44, %v1664_v30  ;;  %v738_v18 = vmul.f32 0.5, %v678_v39 }
 0x1ce   : > { %v690_v47 = vpop.f32.mrf.mxu1 }
 0x1cf   : > { %1355 = verf.f32 %v754_v45  ;;  %v1674_v36 = vadd.f32 %v1664_v30, %v690_v47  ;;  %v759_v48 = vmul.f32 0.70710677, %v1671_v46  ;;  %v743_v47 = vmul.f32 0.5, %v1671_v46 }
 0x1d0   : > { %v1223_v49 = vpop.f32.mrf.mxu1 }
 0x1d1   : > { %v757_v50 = vmul.f32 0.70710677, %v1674_v36  ;;  %v702_v51 = vadd.f32 %v1223_v49, %v1664_v30  ;;  %v741_v39 = vmul.f32 0.5, %v1674_v36 }
 0x1d2   : > { %v693_v42 = vpop.f32.mrf.mxu1 }
 0x1d3   : > { %1357 = verf.f32 %v757_v50  ;;  %v760_v53 = vmul.f32 0.70710677, %v702_v51  ;;  %v694_v54 = vadd.f32 %v1664_v30, %v693_v42  ;;  %v744_v41 = vmul.f32 0.5, %v702_v51 }
 0x1d4   : > { %1359 = verf.f32 %v759_v48  ;;  %v1226_v56 = vpop.f32.mrf.mxu1 }
 0x1d5   : > { %1361 = verf.f32 %v760_v53  ;;  %v758_v58 = vmul.f32 0.70710677, %v694_v54  ;;  %v1681_v52 = vadd.f32 %v1226_v56, %v1664_v30  ;;  %v742_v44 = vmul.f32 0.5, %v694_v54 }
 0x1d6   : > { %v706_v59 = vpop.f32.mrf.mxu1 }
 0x1d7   : > { %1363 = verf.f32 %v758_v58  ;;  %v763_v61 = vmul.f32 0.70710677, %v1681_v52  ;;  %v1685_v0 = vadd.f32 %v1664_v30, %v706_v59 }
 0x1d8   : > { %v1350_v62 = vpop.eup %1349  ;;  %v1227_v1 = vpop.f32.mrf.mxu1 }
 0x1d9   : > { %v1352_v3 = vpop.eup %1351  ;;  %v1688_v4 = vadd.f32 %v1227_v1, %v1664_v30  ;;  %v761_v2 = vmul.f32 0.70710677, %v1685_v0  ;;  %v785_v9 = vadd.f32 1.0, %v1350_v62  ;;  %1365 = verf.f32 %v763_v61 }
 0x1da   : > { %v1354_v6 = vpop.eup %1353  ;;  %v709_v7 = vpop.f32.mrf.mxu1  ;;  %v787_v13 = vadd.f32 1.0, %v1352_v3  ;;  %v745_v1 = vmul.f32 0.5, %v1685_v0 }
 0x1db   : > { %v788_v11 = vadd.f32 1.0, %v1354_v6  ;;  %v764_v8 = vmul.f32 0.70710677, %v1688_v4  ;;  %1367 = verf.f32 %v761_v2  ;;  %v710_v55 = vadd.f32 %v1664_v30, %v709_v7 }
 0x1dc   : > { %v1356_v12 = vpop.eup %1355  ;;  %v1230_v17 = vpop.f32.mrf.mxu1  ;;  %v801_v22 = vmul.f32 %v785_v9, %v737_v60  ;;  %v803_v24 = vmul.f32 %v787_v13, %v739_v63  ;;  %v748_v46 = vmul.f32 0.5, %v1688_v4  ;;  %v747_v60 = vmul.f32 0.5, %v1681_v52 }
 0x1dd   : > { %v786_v57 = vadd.f32 1.0, %v1356_v12  ;;  %1369 = verf.f32 %v764_v8  ;;  %v1694_v19 = vadd.f32 %v1230_v17, %v1664_v30  ;;  %v804_v10 = vmul.f32 %v788_v11, %v740_v15 }
 0x1de   : > { %v762_v20 = vmul.f32 0.70710677, %v710_v55  ;;  %v722_v21 = vpop.f32.mrf.mxu1  ;;  %v746_v3 = vmul.f32 0.5, %v710_v55 }
 0x1df   : > { %v802_v23 = vmul.f32 %v786_v57, %v738_v18  ;;  %v767_v25 = vmul.f32 0.70710677, %v1694_v19  ;;  %v1698_v26 = vadd.f32 %v1664_v30, %v722_v21  ;;  %v818_v31 = vpack.c.bf16 %v804_v10, %v803_v24 }
 0x1e0   : > { %v1358_v5 = vpop.eup %1357  ;;  %1371 = verf.f32 %v762_v20  ;;  %v1231_v27 = vpop.f32.mrf.mxu1  ;;  %v751_v20 = vmul.f32 0.5, %v1694_v19 }
 0x1e1   : > { %v1360_v28 = vpop.eup %1359  ;;  %v817_v14 = vpack.c.bf16 %v802_v23, %v801_v22  ;;  %v734_v16 = vadd.f32 %v1231_v27, %v1664_v30  ;;  %v765_v32 = vmul.f32 0.70710677, %v1698_v26  ;;  %v789_v34 = vadd.f32 1.0, %v1358_v5 }
 0x1e2   : > { %v1362_v29 = vpop.eup %1361  ;;  %v725_v33 = vpop.f32.mrf.mxu1  ;;  %1373 = verf.f32 %v767_v25  ;;  %v791_v40 = vadd.f32 1.0, %v1360_v28  ;;  %v749_v52 = vmul.f32 0.5, %v1698_v26  ;;  %v1130_v28 = vld [vmem:[%s1767_s6] ss:$0 sm:$0xff] }
 0x1e3   : > { %v792_v35 = vadd.f32 1.0, %v1362_v29  ;;  %v768_v37 = vmul.f32 0.70710677, %v734_v16  ;;  %1240 = vmatprep.mubr.msk.bf16.mxu0 %vm615_vm2, %v817_v14  ;;  %1375 = verf.f32 %v765_v32  ;;  %v726_v43 = vadd.f32 %v1664_v30, %v725_v33 }
 0x1e4   : > { %v1364_v38 = vpop.eup %1363  ;;  %1241 = vmatmul.mubr.msk.bf16.vlgmr.msra.gmra.mxu0 %vm615_vm2, %v818_v31  ;;  %v805_v50 = vmul.f32 %v789_v34, %v741_v39  ;;  %v807_v56 = vmul.f32 %v791_v40, %v743_v47  ;;  %v752_v0 = vmul.f32 0.5, %v734_v16 }
 0x1e5   : > { %v790_v45 = vadd.f32 1.0, %v1364_v38  ;;  %1377 = verf.f32 %v768_v37  ;;  %v808_v48 = vmul.f32 %v792_v35, %v744_v41  ;;  %v766_v49 = vmul.f32 0.70710677, %v726_v43 }
 0x1e6   : > { %v1366_v53 = vpop.eup %1365  ;;  %v750_v55 = vmul.f32 0.5, %v726_v43 }
 0x1e7   : > { %v806_v42 = vmul.f32 %v790_v45, %v742_v44  ;;  %1379 = verf.f32 %v766_v49  ;;  %v820_v30 = vpack.c.bf16 %v808_v48, %v807_v56  ;;  %v795_v62 = vadd.f32 1.0, %v1366_v53 }
 0x1e8   : > { %v1368_v51 = vpop.eup %1367 }
 0x1e9   : > { %v819_v58 = vpack.c.bf16 %v806_v42, %v805_v50  ;;  %v793_v36 = vadd.f32 1.0, %v1368_v51  ;;  %v811_v12 = vmul.f32 %v795_v62, %v747_v60 }
 0x1ea   : > { %v1370_v59 = vpop.eup %1369 }
 0x1eb   : > { %v796_v61 = vadd.f32 1.0, %v1370_v59  ;;  %1244 = vmatprep.mubr.msk.bf16.mxu0 %vm615_vm2, %v819_v58  ;;  %v809_v9 = vmul.f32 %v793_v36, %v745_v1 }
 0x1ec   : > { %1245 = vmatmul.mubr.msk.bf16.gmra.mxu0 %vm615_vm2, %v820_v30 }
 0x1ed   : > { %v1372_v54 = vpop.eup %1371  ;;  %v812_v2 = vmul.f32 %v796_v61, %v748_v46 }
 0x1ee   : > { %v794_v6 = vadd.f32 1.0, %v1372_v54 }
 0x1ef   : > { %v1374_v7 = vpop.eup %1373  ;;  %v822_v17 = vpack.c.bf16 %v812_v2, %v811_v12 }
 0x1f0   : > { %v810_v11 = vmul.f32 %v794_v6, %v746_v3  ;;  %v1376_v8 = vpop.eup %1375  ;;  %v799_v63 = vadd.f32 1.0, %v1374_v7 }
 0x1f1   : > { %v797_v57 = vadd.f32 1.0, %v1376_v8 }
 0x1f2   : > { %v1378_v13 = vpop.eup %1377  ;;  %v821_v15 = vpack.c.bf16 %v810_v11, %v809_v9  ;;  %v815_v5 = vmul.f32 %v799_v63, %v751_v20 }
 0x1f3   : > { %v800_v18 = vadd.f32 1.0, %v1378_v13  ;;  %v813_v22 = vmul.f32 %v797_v57, %v749_v52 }
 0x1f4   : > { %1248 = vmatprep.mubr.msk.bf16.mxu0 %vm615_vm2, %v821_v15  ;;  %v1380_v4 = vpop.eup %1379 }
 0x1f5   : > { %1249 = vmatmul.mubr.msk.bf16.gmra.mxu0 %vm615_vm2, %v822_v17  ;;  %v798_v10 = vadd.f32 1.0, %v1380_v4  ;;  %v816_v21 = vmul.f32 %v800_v18, %v752_v0 }
 0x1f7   : > { %v814_v23 = vmul.f32 %v798_v10, %v750_v55  ;;  %v824_v25 = vpack.c.bf16 %v816_v21, %v815_v5 }
 0x1f9   : > { %v823_v24 = vpack.c.bf16 %v814_v23, %v813_v22 }
 0x1fb   : > { %1252 = vmatprep.mubr.msk.bf16.mxu0 %vm615_vm2, %v823_v24 }
 0x1fd   : > { %1253 = vmatmul.mubr.msk.bf16.gmra.mxu0 %vm615_vm2, %v824_v25 }
 0x2a4   : > { %v1242_v27 = vpop.f32.mrf.mxu0 }
 0x2a5   : > { %v931_v32 = vadd.f32 %v1242_v27, %v1130_v28 }
 0x2a6   : > { %v922_v26 = vpop.f32.mrf.mxu0 }
 0x2a7   : > { %v923_v14 = vadd.f32 %v1130_v28, %v922_v26 }
 0x2a8   : > { %v1243_v16 = vpop.f32.mrf.mxu0 }
 0x2a9   : > { %985 = vxpose.xlu0.b32.start [1/16] (narrow) %v923_v14, 8  ;;  %v934_v34 = vadd.f32 %v1243_v16, %v1130_v28 }
 0x2aa   : > { %v925_v19 = vpop.f32.mrf.mxu0 }
 0x2ab   : > { %v926_v29 = vadd.f32 %v1130_v28, %v925_v19 }
 0x2ac   : > { %v1246_v31 = vpop.f32.mrf.mxu0 }
 0x2ad   : > { %986 = vxpose.xlu0.b32.cont [2/16] (narrow) %v926_v29, 8  ;;  %v947_v43 = vadd.f32 %v1246_v31, %v1130_v28 }
 0x2ae   : > { %v938_v33 = vpop.f32.mrf.mxu0 }
 0x2af   : > { %v939_v37 = vadd.f32 %v1130_v28, %v938_v33 }
 0x2b0   : > { %v1247_v35 = vpop.f32.mrf.mxu0 }
 0x2b1   : > { %987 = vxpose.xlu0.b32.cont [3/16] (narrow) %v931_v32, 8  ;;  %v950_v44 = vadd.f32 %v1247_v35, %v1130_v28 }
 0x2b2   : > { %v941_v38 = vpop.f32.mrf.mxu0 }
 0x2b3   : > { %v942_v40 = vadd.f32 %v1130_v28, %v941_v38 }
 0x2b5   : > { %988 = vxpose.xlu0.b32.cont [4/16] (narrow) %v934_v34, 8  ;;  %v1250_v41 = vpop.f32.mrf.mxu0 }
 0x2b6   : > { %v963_v42 = vadd.f32 %v1250_v41, %v1130_v28 }
 0x2b7   : > { %v954_v39 = vpop.f32.mrf.mxu0 }
 0x2b8   : > { %v955_v47 = vadd.f32 %v1130_v28, %v954_v39 }
 0x2b9   : > { %989 = vxpose.xlu0.b32.cont [5/16] (narrow) %v939_v37, 8  ;;  %v1251_v45 = vpop.f32.mrf.mxu0 }
 0x2ba   : > { %v966_v56 = vadd.f32 %v1251_v45, %v1130_v28 }
 0x2bb   : > { %v957_v48 = vpop.f32.mrf.mxu0 }
 0x2bc   : > { %v958_v49 = vadd.f32 %v1130_v28, %v957_v48 }
 0x2bd   : > { %990 = vxpose.xlu0.b32.cont [6/16] (narrow) %v942_v40, 8  ;;  %v1254_v50 = vpop.f32.mrf.mxu0 }
 0x2be   : > { %v979_v61 = vadd.f32 %v1254_v50, %v1130_v28 }
 0x2bf   : > { %v970_v53 = vpop.f32.mrf.mxu0 }
 0x2c0   : > { %v971_v58 = vadd.f32 %v1130_v28, %v970_v53 }
 0x2c1   : > { %991 = vxpose.xlu0.b32.cont [7/16] (narrow) %v947_v43, 8  ;;  %v1255_v51 = vpop.f32.mrf.mxu0 }
 0x2c2   : > { %v982_v36 = vadd.f32 %v1255_v51, %v1130_v28 }
 0x2c3   : > { %v973_v59 = vpop.f32.mrf.mxu0 }
 0x2c4   : > { %v974_v30 = vadd.f32 %v1130_v28, %v973_v59 }
 0x2c5   : > { %992 = vxpose.xlu0.b32.cont [8/16] (narrow) %v950_v44, 8 }
 0x2c9   : > { %993 = vxpose.xlu0.b32.cont [9/16] (narrow) %v955_v47, 8 }
 0x2cd   : > { %994 = vxpose.xlu0.b32.cont [10/16] (narrow) %v958_v49, 8 }
 0x2d1   : > { %995 = vxpose.xlu0.b32.cont [11/16] (narrow) %v963_v42, 8 }
 0x2d5   : > { %996 = vxpose.xlu0.b32.cont [12/16] (narrow) %v966_v56, 8 }
 0x2d9   : > { %997 = vxpose.xlu0.b32.cont [13/16] (narrow) %v971_v58, 8 }
 0x2dd   : > { %998 = vxpose.xlu0.b32.cont [14/16] (narrow) %v974_v30, 8 }
 0x2e1   : > { %999 = vxpose.xlu0.b32.cont [15/16] (narrow) %v979_v61, 8 }
 0x2e5   : > { %1000 = vxpose.xlu0.b32.end [16/16] (narrow) %v982_v36, 8 }
 0x325   : > { %v1001_v54 = vpop.trf.xlu0 }
 0x326   : > { %v1143_v62 = vmul.f32 -1.442695, %v1001_v54 }
 0x328   : > { %1381 = vpow2.f32 %v1143_v62 }
 0x335   : > { %v1382_v46 = vpop.eup %1381 }
 0x336   : > { %v1020_v1 = vadd.f32 1.0, %v1382_v46 }
 0x338   : > { %1383 = vrcp.f32 %v1020_v1 }
 0x345   : > { %v1384_v3 = vpop.eup %1383 }
 0x346   : > { %1023 = vst [vmem:[%s284_s23] sm:$0x7] %v1384_v3 }
 0x347   : > { %1398 = shalt.err (!%p1395_p3)
}
 0x348   : > { %s1399_s18 = scalar_lea.hbm %s1726_s13, 64  ;;  %s1403_s21 = scalar_lea.hbm %s1768_s7, 192 }
 0x349   : > { %p1400_p4 = scmp.ne.s32.totalorder %s1726_s13, %s1399_s18  ;;  %p1404_p9 = scmp.lt.s32.totalorder %s1726_s13, %s1768_s7 }
 0x34a   : > { %p1405_p10 = scmp.lt.s32.totalorder %s1403_s21, %s1399_s18 }
 0x34b   : > { %p1401_p7 = pnand %p1400_p4, %p1526_p5 }
 0x34c   : > { %p1406_p11 = por %p1405_p10, %p1404_p9 }
 0x34d   : > { %p1402_p8 = pneg %p1401_p7 }
 0x34f   : > { %p1407_p12 = pnand %p1406_p11, %p1402_p8 }
 0x351   : > { %1410 = shalt.err (!%p1407_p12)
}
 0x352   : > { %1266 = dma.vmem_to_hbm [thread:$0]  (%p1526_p5), %s1039_s29, 64, %s1726_s13, %s1025_s14  }
 0x353 PF: > { %p1272_p13 = scmp.ge.s32.totalorder %s1445_s27, 2  ;;  %s1050_s8 = sand.u32 1, %s1433_s24  }
 0x354   : > { %s1051_s9 = scalar_lea.sflag [#allocation3], %s1050_s8 }
 0x355   : > { %p1269_p0 = pnand %p1272_p13, %p1530_p6 }
 0x357   : > { %p1270_p1 = pneg %p1269_p0 }
 0x359   : > { %1428 = dma.done.wait (%p1270_p1), %s1051_s9, 64  }
 0x35a   : > { %1430 = vsyncadd (%p1270_p1), %s1051_s9, 4294967232  ;;  %p17_p2 = scmp.ge.s32.totalorder %s1513_s30, 5   ;;  %s1771_s24 = smov %s1437_s25 }
 0x35b   : > { %s1772_s25 = smov %s1441_s26  ;;  %s1773_s26 = smov %s1524_s10 }
 0x35c   : > { %s1774_s27 = smov %s1513_s30  ;;  %19 = sbr.rel (!%p17_p2) target bundleno = 3 (0x3), region = 83 }
 0x361   :  { %1056 = vsyncpa [#allocation3], 1 }
 0x362   :  { %1058 = vsyncpa [#allocation3 + $0x1], 1 }

</bundles_post_ra>
